<compile_context>
chip_gen: v7x
topology: tpu7x:2x2x1
jax: 0.10.0
libtpu: 0.0.40
codegen_flags: <defaults>
</compile_context>

<pallas_src>
import functools

import numpy as np

import jax
import jax.numpy as jnp
from jax.experimental import pallas as pl
from jax.experimental.pallas import tpu as pltpu


# ---------------------------------------------------------------------------
# Kernels
# ---------------------------------------------------------------------------

def _xw_kernel(h_ref, w_ref, o_ref):
    # o = H_block @ W   (bf16 x bf16 -> f32 accumulate -> bf16 out)
    o_ref[...] = jnp.dot(h_ref[...], w_ref[...],
                         preferred_element_type=jnp.float32).astype(o_ref.dtype)


def _agg_kernel(kidx_ref, cnt_ref, a_ref, hw_ref, b_ref, o_ref, acc_ref, *,
                tk, max_nnz, relu):
    # H_out[i_block] = act( sum_{k in nonzero blocks of row-block i}
    #                       A[i_block, k] @ HW[k] + b )
    i = pl.program_id(0)
    k = pl.program_id(1)

    @pl.when(k == 0)
    def _():
        acc_ref[...] = jnp.zeros_like(acc_ref)

    # Tail guard: padded k entries (k >= count) are skipped; the padded index
    # repeats the last valid block, so the pipeline issues no extra DMA.
    @pl.when(k < cnt_ref[i])
    def _():
        kb = kidx_ref[i * max_nnz + k]                 # SMEM scalar read
        start = pl.multiple_of(kb * tk, tk)
        acc_ref[...] += jnp.dot(a_ref[...], hw_ref[pl.ds(start, tk), :],
                                preferred_element_type=jnp.float32)

    @pl.when(k == pl.num_programs(1) - 1)
    def _():
        h = acc_ref[...] + b_ref[...]                  # bias + activation in f32
        if relu:
            h = jnp.maximum(h, 0.0)
        o_ref[...] = h.astype(o_ref.dtype)


def _head_kernel(pa_ref, h_ref, w_ref, b_ref, out_ref, acc_ref):
    # pooled = (P @ A) @ H3 @ W4 + b4 ; out = log_softmax(pooled, axis=1)
    # Blocked over the N axis; tiny (B, fo) f32 accumulator.
    k = pl.program_id(0)

    @pl.when(k == 0)
    def _():
        acc_ref[...] = jnp.zeros_like(acc_ref)

    acc_ref[...] += jnp.dot(pa_ref[...], h_ref[...],
                            preferred_element_type=jnp.float32)

    @pl.when(k == pl.num_programs(0) - 1)
    def _():
        pooled = jnp.dot(acc_ref[...], w_ref[...],
                         preferred_element_type=jnp.float32) + b_ref[...]
        m = jnp.max(pooled, axis=1, keepdims=True)
        z = pooled - m
        lse = jnp.log(jnp.sum(jnp.exp(z), axis=1, keepdims=True))
        out_ref[...] = z - lse


# ---------------------------------------------------------------------------
# Tile / VMEM helpers
# ---------------------------------------------------------------------------

_ROW_TILE_CANDS = (2048, 1024, 512, 256, 128, 64, 32, 16)   # multiples of 16 (bf16)
_COL_TILE_CANDS = (2048, 1024, 512, 256, 128)               # multiples of 128 (lanes)


def _row_tile(n, pref=2048, min_blocks=4):
    # Keep >= min_blocks row blocks so v7x's 2 TensorCores (parallel axis) both
    # get work; row tiles are multiples of 16 for bf16 sublane packing.
    for t in _ROW_TILE_CANDS:
        if t <= pref and t <= n and n % t == 0 and n // t >= min_blocks:
            return t
    for t in _ROW_TILE_CANDS:
        if t <= pref and t <= n and n % t == 0:
            return t
    return n


def _col_tile(n, pref=2048):
    # A's last-dim tiles must be multiples of 128 (or the full extent).
    for t in _COL_TILE_CANDS:
        if t <= pref and t <= n and n % t == 0:
            return t
    return n


@functools.lru_cache(maxsize=None)
def _vmem_limit_bytes():
    cap = 64 * 1024 * 1024                    # conservative default (v7x physical)
    try:
        cap = int(pltpu.get_tpu_info().vmem_capacity_bytes)
    except Exception:
        pass
    # ~48 MiB on v7x (64 MiB VMEM), 64 MiB on v5e/v6e (128 MiB VMEM).
    return int(min(cap * 3 // 4, 64 * 1024 * 1024))


def _round_up(n, m):
    return ((n + m - 1) // m) * m


# ---------------------------------------------------------------------------
# Graph / parameter preprocessing (structure-only, cacheable across forwards)
# ---------------------------------------------------------------------------

def _block_sparse_meta(a_hat, tm, tk):
    """Per-row-block lists of nonzero A column-block indices (+ counts)."""
    a_np = np.asarray(a_hat)
    nb_r, nb_c = a_np.shape[0] // tm, a_np.shape[1] // tk
    blk = np.abs(a_np).reshape(nb_r, tm, nb_c, tk).max(axis=(1, 3)) > 0.0
    counts = blk.sum(axis=1).astype(np.int32)
    max_nnz = max(int(counts.max()), 1)
    kidx = np.zeros((nb_r, max_nnz), dtype=np.int32)
    for i in range(nb_r):
        nz = np.flatnonzero(blk[i])
        if nz.size:
            kidx[i, :nz.size] = nz
            kidx[i, nz.size:] = nz[-1]    # pad w/ last valid -> revisit, no extra DMA
    nnz = int(counts.sum())
    # Flattened 1D SMEM layout avoids 2D SMEM column padding.
    return jnp.asarray(kidx.reshape(-1)), jnp.asarray(counts), max_nnz, nnz


def prepare_graph(a_hat, pool, *, tm=None, tk=None):
    """Precompute graph-structure-only tensors (cache these across forwards)."""
    n = a_hat.shape[0]
    tm = _row_tile(n) if tm is None else tm
    tk = _col_tile(n) if tk is None else tk
    a_bf16 = a_hat.astype(jnp.bfloat16)
    kidx, counts, max_nnz, nnz = _block_sparse_meta(a_hat, tm, tk)
    # Fused layer-4 + mean pool identity: pool@(A@HW+b) == (pool@A)@HW + b
    # (pool rows sum to 1).  PA computed once from the already-cast bf16 A.
    pa = jnp.dot(pool.astype(jnp.bfloat16), a_bf16,
                 preferred_element_type=jnp.float32).astype(jnp.bfloat16)
    return {"a": a_bf16, "kidx": kidx, "counts": counts, "max_nnz": max_nnz,
            "nnz": nnz, "pa": pa, "tm": tm, "tk": tk}


def prepare_params(params):
    """Zero-pad hidden feature dims to multiples of 128 (lane-dense stores).

    Padded W columns / b entries are zero and padded W rows are zero, so the
    extra features stay exactly zero through relu and never reach the logits.
    """
    padded = []
    prev_fo = params[0][0].shape[0]
    for li, (w, b) in enumerate(params):
        fi, fo = w.shape
        fi_p = prev_fo if li > 0 else fi
        fo_p = fo if li == len(params) - 1 else _round_up(fo, 128)
        wp = jnp.zeros((fi_p, fo_p), jnp.float32).at[:fi, :fo].set(w)
        bp = jnp.zeros((1, fo_p), jnp.float32).at[:, :fo].set(b.reshape(1, -1))
        padded.append((wp, bp))
        prev_fo = fo_p
    return padded


# ---------------------------------------------------------------------------
# Pallas wrappers
# ---------------------------------------------------------------------------

def _xw(h, w, *, tm):
    N, fi = h.shape
    fo = w.shape[1]
    return pl.pallas_call(
        _xw_kernel,
        out_shape=jax.ShapeDtypeStruct((N, fo), jnp.bfloat16),
        grid=(N // tm,),
        in_specs=[pl.BlockSpec((tm, fi), lambda i: (i, 0)),
                  pl.BlockSpec((fi, fo), lambda i: (0, 0))],
        out_specs=pl.BlockSpec((tm, fo), lambda i: (i, 0)),
        compiler_params=pltpu.CompilerParams(
            dimension_semantics=("parallel",),
            vmem_limit_bytes=_vmem_limit_bytes()),
        cost_estimate=pl.CostEstimate(
            flops=2 * N * fi * fo, transcendentals=0,
            bytes_accessed=2 * (N * fi + fi * fo + N * fo)),
    )(h, w)


def _aggregate(a, kidx, counts, max_nnz, nnz, hw, b, *, tm, tk, relu):
    N = a.shape[0]
    fo = hw.shape[1]
    kernel = functools.partial(_agg_kernel, tk=tk, max_nnz=max_nnz, relu=relu)

    def a_map(i, k, kidx_r, cnt_r):
        return (i, kidx_r[i * max_nnz + k])       # gather only nonzero A tiles

    return pl.pallas_call(
        kernel,
        out_shape=jax.ShapeDtypeStruct((N, fo), jnp.bfloat16),
        grid_spec=pltpu.PrefetchScalarGridSpec(
            num_scalar_prefetch=2,
            grid=(N // tm, max_nnz),
            in_specs=[
                pl.BlockSpec((tm, tk), a_map),                          # sparse A tiles
                pl.BlockSpec((N, fo), lambda i, k, kidx_r, cnt_r: (0, 0)),  # resident HW
                pl.BlockSpec((1, fo), lambda i, k, kidx_r, cnt_r: (0, 0)),  # bias
            ],
            out_specs=pl.BlockSpec((tm, fo), lambda i, k, kidx_r, cnt_r: (i, 0)),
            scratch_shapes=[pltpu.VMEM((tm, fo), jnp.float32)],
        ),
        compiler_params=pltpu.CompilerParams(
            dimension_semantics=("parallel", "arbitrary"),
            vmem_limit_bytes=_vmem_limit_bytes()),
        cost_estimate=pl.CostEstimate(
            flops=2 * nnz * tm * tk * fo, transcendentals=0,
            bytes_accessed=2 * nnz * tm * tk + 4 * N * fo + 4 * fo),
    )(kidx, counts, a, hw, b)


def _head(pa, h, w4, b4, *, tk):
    B, N = pa.shape
    fo = h.shape[1]
    C = w4.shape[1]
    return pl.pallas_call(
        _head_kernel,
        out_shape=jax.ShapeDtypeStruct((B, C), jnp.float32),
        grid=(N // tk,),
        in_specs=[pl.BlockSpec((B, tk), lambda k: (0, k)),
                  pl.BlockSpec((tk, fo), lambda k: (k, 0)),
                  pl.BlockSpec((fo, C), lambda k: (0, 0)),
                  pl.BlockSpec((1, C), lambda k: (0, 0))],
        out_specs=pl.BlockSpec((B, C), lambda k: (0, 0)),
        scratch_shapes=[pltpu.VMEM((B, fo), jnp.float32)],
        compiler_params=pltpu.CompilerParams(
            dimension_semantics=("arbitrary",),
            vmem_limit_bytes=_vmem_limit_bytes()),
    )(pa, h, w4, b4)


def gcn_forward(graph, x, params):
    """graph: output of prepare_graph; params: output of prepare_params."""
    tm, tk = graph["tm"], graph["tk"]
    a, kidx, counts = graph["a"], graph["kidx"], graph["counts"]
    max_nnz, nnz, pa = graph["max_nnz"], graph["nnz"], graph["pa"]

    (w1, b1), (w2, b2), (w3, b3), (w4, b4) = params

    # Layer 1: fi=2 -> H@W in plain XLA (MXU would idle at K=2).
    hw = jnp.dot(x, w1).astype(jnp.bfloat16)
    h = _aggregate(a, kidx, counts, max_nnz, nnz, hw, b1, tm=tm, tk=tk, relu=True)

    # Layers 2-3: Pallas H@W then block-sparse aggregate (relu).
    for (w, b) in ((w2, b2), (w3, b3)):
        hw = _xw(h, w.astype(jnp.bfloat16), tm=tm)
        h = _aggregate(a, kidx, counts, max_nnz, nnz, hw, b, tm=tm, tk=tk, relu=True)

    # Layer 4 fused with global mean pool + log_softmax.
    return _head(pa, h, w4, b4, tk=tk)


def _glorot(key, shape):
    fan_in, fan_out = shape
    limit = jnp.sqrt(6.0 / (fan_in + fan_out))
    return jax.random.uniform(key, shape, jnp.float32, -limit, limit)


# ---------------------------------------------------------------------------
# Demo / correctness check
# ---------------------------------------------------------------------------

if __name__ == "__main__":
    key = jax.random.PRNGKey(0)
    k_x, k1, k2, k3, k4 = jax.random.split(key, 5)

    # synthetic batch: 4 graphs x 96 nodes (N=384), 2 input features.
    # 96-node graphs straddle 128-wide column blocks -> per-row-block nnz
    # counts vary, exercising the block-sparse tail guard.
    n_graphs = 4
    nodes_per_graph = 96
    N = n_graphs * nodes_per_graph
    batch = jnp.repeat(jnp.arange(n_graphs, dtype=jnp.int32), nodes_per_graph)
    x = jax.random.normal(k_x, (N, 2), dtype=jnp.float32)

    # undirected ring edges within each graph
    src, dst = [], []
    for g in range(n_graphs):
        base = g * nodes_per_graph
        for i in range(nodes_per_graph):
            src.append(base + i)
            dst.append(base + (i + 1) % nodes_per_graph)
    edge_index = jnp.array([src + dst, dst + src], dtype=jnp.int32)   # [2, E]

    # dense normalized adjacency A_hat = D^-1/2 (A + I) D^-1/2  (glue, plain JAX)
    adj = jnp.zeros((N, N), jnp.float32).at[edge_index[0], edge_index[1]].set(1.0)
    adj = adj + jnp.eye(N, dtype=jnp.float32)
    deg = adj.sum(axis=1)
    dinv = 1.0 / jnp.sqrt(deg)
    a_hat = adj * dinv[:, None] * dinv[None, :]

    # mean-pooling matrix P: [B, N]
    one_hot = (batch[None, :] == jnp.arange(n_graphs)[:, None]).astype(jnp.float32)
    pool = one_hot / one_hot.sum(axis=1, keepdims=True)

    # deterministic parameters: GCNConv(2,128), (128,64), (64,18), (18,3)
    dims = [(2, 128), (128, 64), (64, 18), (18, 3)]
    keys = [k1, k2, k3, k4]
    params = []
    for kk, (fi, fo) in zip(keys, dims):
        w = _glorot(kk, (fi, fo))
        b = jnp.zeros((1, fo), dtype=jnp.float32)
        params.append((w, b))

    # structure-only + parameter preprocessing (cacheable across forwards)
    graph = prepare_graph(a_hat, pool)
    padded_params = prepare_params(params)

    out = gcn_forward(graph, x, padded_params)
    out = jax.block_until_ready(out)

    # pure-JAX f32 reference (same math, unpadded params, outside Pallas)
    h = x
    for li, (w, b) in enumerate(params):
        h = a_hat @ (h @ w) + b
        if li < 3:
            h = jnp.maximum(h, 0.0)
    ref = jax.nn.log_softmax(pool @ h, axis=1)

    assert out.shape == (n_graphs, 3)
    # bf16 MXU operands (f32 accumulation) -> loosened tolerance vs f32 reference
    assert jnp.allclose(out, ref, atol=2e-2, rtol=2e-2), (
        float(jnp.max(jnp.abs(out - ref))))

    print("KERNEL_OK")
</pallas_src>

<mosaic_0001>
module attributes {stable_mosaic.version = 11 : i64} {
  func.func @_agg_kernel(%arg0: i32, %arg1: i32, %arg2: memref<12xi32, #tpu.memory_space<smem>>, %arg3: memref<6xi32, #tpu.memory_space<smem>>, %arg4: memref<64x128xbf16, #tpu.memory_space<vmem>>, %arg5: memref<384x128xbf16, #tpu.memory_space<vmem>>, %arg6: memref<1x128xf32, #tpu.memory_space<vmem>>, %arg7: memref<64x128xbf16, #tpu.memory_space<vmem>>, %arg8: memref<64x128xf32, #tpu.memory_space<vmem>>) attributes {dimension_semantics = [#tpu.dimension_semantics<parallel>, #tpu.dimension_semantics<arbitrary>], iteration_bounds = array<i64: 6, 2>, scalar_prefetch = 2 : i64, scratch_operands = 1 : i64, tpu.core_type = #tpu.core_type<tc>, window_params = [{transform_indices = @transform_0, window_bounds = array<i64: 64, 128>}, {pipeline_mode = #tpu.pipeline_mode<synchronous>, transform_indices = @transform_1, window_bounds = array<i64: 384, 128>}, {pipeline_mode = #tpu.pipeline_mode<synchronous>, transform_indices = @transform_2, window_bounds = array<i64: 1, 128>}, {transform_indices = @transform_3, window_bounds = array<i64: 64, 128>}]} {
    %c0_i32 = arith.constant 0 : i32
    %0 = arith.cmpi eq, %arg1, %c0_i32 : i32
    %1 = arith.extui %0 : i1 to i32
    %c0_i32_0 = arith.constant 0 : i32
    %2 = arith.cmpi ne, %1, %c0_i32_0 : i32
    scf.if %2 {
      %cst = arith.constant 0.000000e+00 : f32
      %11 = vector.broadcast %cst : f32 to vector<64x128xf32>
      %c0 = arith.constant 0 : index
      %c0_3 = arith.constant 0 : index
      %12 = vector.load %arg8[%c0, %c0_3] : memref<64x128xf32, #tpu.memory_space<vmem>>, vector<64x128xf32>
      tpu.vector_store %arg8[%c0, %c0_3], %11 {strides = array<i32>} : memref<64x128xf32, #tpu.memory_space<vmem>>, vector<64x128xf32>,
    } else {
    }
    %3 = arith.index_cast %arg0 : i32 to index
    %4 = memref.load %arg3[%3] : memref<6xi32, #tpu.memory_space<smem>>
    %5 = arith.cmpi slt, %arg1, %4 : i32
    %6 = arith.extui %5 : i1 to i32
    %c0_i32_1 = arith.constant 0 : i32
    %7 = arith.cmpi ne, %6, %c0_i32_1 : i32
    scf.if %7 {
      %c2_i32 = arith.constant 2 : i32
      %11 = arith.muli %arg0, %c2_i32 : i32
      %12 = arith.addi %11, %arg1 : i32
      %13 = arith.index_cast %12 : i32 to index
      %14 = memref.load %arg2[%13] : memref<12xi32, #tpu.memory_space<smem>>
      %c128_i32 = arith.constant 128 : i32
      %15 = arith.muli %14, %c128_i32 : i32
      %16 = tpu.assume_multiple %15, 128 : i32
      %c0 = arith.constant 0 : index
      %c0_3 = arith.constant 0 : index
      %17 = vector.load %arg8[%c0, %c0_3] : memref<64x128xf32, #tpu.memory_space<vmem>>, vector<64x128xf32>
      %c0_4 = arith.constant 0 : index
      %c0_5 = arith.constant 0 : index
      %18 = vector.load %arg4[%c0_4, %c0_5] : memref<64x128xbf16, #tpu.memory_space<vmem>>, vector<64x128xbf16>
      %19 = arith.index_cast %16 : i32 to index
      %c0_6 = arith.constant 0 : index
      %20 = vector.load %arg5[%19, %c0_6] : memref<384x128xbf16, #tpu.memory_space<vmem>>, vector<128x128xbf16>
      %cst = arith.constant dense<0.000000e+00> : vector<64x128xf32>
      %21 = tpu.matmul %18, %20, %cst {dimension_numbers = #tpu.dot_dimension_numbers<[1], [0], [0], [1], [0, 0, 1, 1], [], []>} : vector<64x128xbf16>, vector<128x128xbf16>, vector<64x128xf32> -> vector<64x128xf32>
      %22 = arith.addf %17, %21 : vector<64x128xf32>
      %c0_7 = arith.constant 0 : index
      %c0_8 = arith.constant 0 : index
      %23 = vector.load %arg8[%c0_7, %c0_8] : memref<64x128xf32, #tpu.memory_space<vmem>>, vector<64x128xf32>
      tpu.vector_store %arg8[%c0_7, %c0_8], %22 {strides = array<i32>} : memref<64x128xf32, #tpu.memory_space<vmem>>, vector<64x128xf32>,
    } else {
    }
    %c1_i32 = arith.constant 1 : i32
    %8 = arith.cmpi eq, %arg1, %c1_i32 : i32
    %9 = arith.extui %8 : i1 to i32
    %c0_i32_2 = arith.constant 0 : i32
    %10 = arith.cmpi ne, %9, %c0_i32_2 : i32
    scf.if %10 {
      %c0 = arith.constant 0 : index
      %c0_3 = arith.constant 0 : index
      %11 = vector.load %arg8[%c0, %c0_3] : memref<64x128xf32, #tpu.memory_space<vmem>>, vector<64x128xf32>
      %c0_4 = arith.constant 0 : index
      %c0_5 = arith.constant 0 : index
      %12 = vector.load %arg6[%c0_4, %c0_5] : memref<1x128xf32, #tpu.memory_space<vmem>>, vector<1x128xf32>
      %13 = vector.broadcast %12 : vector<1x128xf32> to vector<64x128xf32>
      %14 = arith.addf %11, %13 : vector<64x128xf32>
      %cst = arith.constant 0.000000e+00 : f32
      %15 = vector.broadcast %cst : f32 to vector<64x128xf32>
      %16 = arith.maximumf %14, %15 : vector<64x128xf32>
      %17 = arith.truncf %16 : vector<64x128xf32> to vector<64x128xbf16>
      %c0_6 = arith.constant 0 : index
      %c0_7 = arith.constant 0 : index
      %18 = vector.load %arg7[%c0_6, %c0_7] : memref<64x128xbf16, #tpu.memory_space<vmem>>, vector<64x128xbf16>
      tpu.vector_store %arg7[%c0_6, %c0_7], %17 {strides = array<i32>} : memref<64x128xbf16, #tpu.memory_space<vmem>>, vector<64x128xbf16>,
    } else {
    }
    return
  }
  func.func @transform_0(%arg0: i32, %arg1: i32, %arg2: memref<12xi32, #tpu.memory_space<smem>>, %arg3: memref<6xi32, #tpu.memory_space<smem>>) -> (i32, i32) {
    %c2_i32 = arith.constant 2 : i32
    %0 = arith.muli %arg0, %c2_i32 : i32
    %1 = arith.addi %0, %arg1 : i32
    %2 = arith.index_cast %1 : i32 to index
    %3 = memref.load %arg2[%2] : memref<12xi32, #tpu.memory_space<smem>>
    %c0_i32 = arith.constant 0 : i32
    return %arg0, %3 : i32, i32
  }
  func.func @transform_1(%arg0: i32, %arg1: i32, %arg2: memref<12xi32, #tpu.memory_space<smem>>, %arg3: memref<6xi32, #tpu.memory_space<smem>>) -> (i32, i32) {
    %c0_i32 = arith.constant 0 : i32
    %c0_i32_0 = arith.constant 0 : i32
    %c0_i32_1 = arith.constant 0 : i32
    return %c0_i32, %c0_i32_0 : i32, i32
  }
  func.func @transform_2(%arg0: i32, %arg1: i32, %arg2: memref<12xi32, #tpu.memory_space<smem>>, %arg3: memref<6xi32, #tpu.memory_space<smem>>) -> (i32, i32) {
    %c0_i32 = arith.constant 0 : i32
    %c0_i32_0 = arith.constant 0 : i32
    %c0_i32_1 = arith.constant 0 : i32
    return %c0_i32, %c0_i32_0 : i32, i32
  }
  func.func @transform_3(%arg0: i32, %arg1: i32, %arg2: memref<12xi32, #tpu.memory_space<smem>>, %arg3: memref<6xi32, #tpu.memory_space<smem>>) -> (i32, i32) {
    %c0_i32 = arith.constant 0 : i32
    %c0_i32_0 = arith.constant 0 : i32
    return %arg0, %c0_i32 : i32, i32
  }
}

</mosaic_0001>

<bundles_post_ra>
// kernel: tpu_custom_call.1
= control target key start
LH: loop header
LB: loop body
LE: loop exit
PB: predicated region body
PF: predicated region fallthrough
CT: control target
= control target key end

     0   :  { %s1499_s0 = inlined_call_operand.hbm [shape: s32[12], index: 0, kind: input, shape index: {}]   ;;  %s1500_s2 = inlined_call_operand.hbm [shape: bf16[384,384], index: 2, kind: input, shape index: {}]   ;;  %s1501_s3 = inlined_call_operand.hbm [shape: bf16[384,128], index: 3, kind: input, shape index: {}]   ;;  %s1502_s4 = inlined_call_operand.vmem [shape: f32[1,128], index: 4, kind: input, shape index: {}]   ;;  %s1503_s5 = inlined_call_operand.hbm [shape: bf16[384,128], index: 5, kind: output, shape index: {}]   ;;  %s1504_s1 = inlined_call_operand.vmem [shape: s32[6], index: 1, kind: input, shape index: {}]  }
   0x1   :  { %1528 = sst [smem:[#allocation27_spill]] %s1501_s3  ;;  %s912_s20 = scalar_lea.hbm %s1499_s0, 16 }
   0x2   :  { %1529 = sst [smem:[#allocation28_spill]] %s1502_s4  ;;  %p913_p0 = scmp.ne.s32.totalorder %s1499_s0, %s912_s20 }
   0x3   :  { %1530 = sst [smem:[#allocation29_spill]] %s1503_s5  ;;  %p916_p1 = scmp.lt.u32.totalorder %s912_s20, %s1499_s0 }
   0x5   :  { %p918_p2 = pnand %p916_p1, %p913_p0 }
   0x7   :  { %921 = shalt.err (!%p918_p2)  }
   0x8   :  { %s1122_s25 = smov [#allocation4]   ;;  %s12_s30 = sshll.u32 %s1504_s1, 4  ;;  %s13_s30 = int_to_ptr.vmem [resolvable:$true] %s12_s30 }
   0x9   :  { %11 = dma.hbm_to_smem %s1499_s0, 16, %s1122_s25, [#allocation3] }
   0xa   :  { %s922_s6 = scalar_lea.vmem %s13_s30, 16  ;;  %p927_p4 = scmp.lt.s32.totalorder %s13_s30, %s13_s30 }
   0xb   :  { %p923_p3 = scmp.ne.s32.totalorder %s13_s30, %s922_s6  ;;  %p928_p5 = scmp.lt.s32.totalorder %s922_s6, %s922_s6 }
   0xd   :  { %p929_p6 = por %p928_p5, %p927_p4 }
   0xf   :  { %p930_p7 = pnand %p929_p6, %p923_p3 }
  0x11   :  { %933 = shalt.err (!%p930_p7)  }
  0x12   :  { %s1123_s7 = smov [#allocation5]  }
  0x13   :  { %15 = dma.vmem_to_smem %s13_s30, 16, %s1123_s7, [#allocation3] }
  0x14   :  { %1064 = dma.done.wait [#allocation3], 32 }
  0x15   :  { %1065 = vsyncadd [#allocation3], 4294967264 }
  0x16   :  { %17 = sfence }
  0x17   :  { %18 = vsyncpa [#allocation7], 0 }
  0x18   :  { %20 = vsyncpa [#allocation7 + $0x1], 0 }
  0x19   :  { %21 = vsyncpa [#allocation10], 0 }
  0x1a   :  { %22 = vsyncpa [#allocation8], 0 }
  0x1b   :  { %24 = vsyncpa [#allocation8 + $0x1], 0  ;;  %s1178_s0 = smov 0   ;;  %s1180_s1 = smov 0  }
  0x1c   :  { %s1182_s8 = smov 0   ;;  %s1184_s9 = smov 0  }
  0x1d   :  { %s1186_s10 = smov 0   ;;  %s1188_s11 = smov 0  }
  0x1e   :  { %s1190_s12 = smov 0   ;;  %s1192_s13 = smov 0  }
  0x1f   :  { %s1194_s14 = smov 0   ;;  %s1196_s15 = smov 0  }
  0x20   :  { %s1198_s16 = smov 0  }
  0x21 LB: > { %1531 = sst [smem:[#allocation18_spill]] %s1080_s0  ;;  %s642_s17 = sadd.s32 4294967295, %s1120_s16   ;;  %s1120_s16 = sphi %s1198_s16, %s30_s16   ;;  %s1116_s15 = sphi %s1196_s15, %s1578_s15   ;;  %s1112_s14 = sphi %s1194_s14, %s1570_s14   ;;  %s1108_s13 = sphi %s1192_s13, %s1577_s13   ;;  %s1104_s12 = sphi %s1190_s12, %s1569_s12   ;;  %s1100_s11 = sphi %s1188_s11, %s1576_s11   ;;  %s1096_s10 = sphi %s1186_s10, %s1575_s10   ;;  %s1092_s9 = sphi %s1184_s9, %s1574_s9   ;;  %s1088_s8 = sphi %s1182_s8, %s1568_s8   ;;  %s1084_s1 = sphi %s1180_s1, %s1573_s1   ;;  %s1080_s0 = sphi %s1178_s0, %s1572_s0  }
  0x22   : > { %1532 = sst [smem:[#allocation19_spill]] %s1088_s8  ;;  %s643_s18 = sadd.s32 4294967294, %s1120_s16  }
  0x23   : > { %1533 = sst [smem:[#allocation20_spill]] %s1112_s14  ;;  %p70_p8 = scmp.ne.s32.totalorder %s1096_s10, %s1092_s9 }
  0x24   : > { %1534 = sst [smem:[#allocation21_spill]] %s1120_s16  ;;  %p64_p9 = scmp.ne.s32.totalorder %s1100_s11, %s1096_s10 }
  0x25   : > { %p1236_p10 = scmp.eq.s32.totalorder %s642_s17, 0  ;;  %p65_p11 = scmp.eq.s32.totalorder %s1120_s16, 0 }
  0x26   : > { %p135_p12 = scmp.ne.s32.totalorder %s1088_s8, %s1084_s1  ;;  %p136_p0 = scmp.eq.s32.totalorder %s642_s17, 11 }
  0x27   : > { %s1535_s19 = scalar_select %p1236_p10, 1, 0 }
  0x28   : > { %p1245_p13 = por %p1236_p10, %p70_p8  ;;  %p141_p1 = scmp.ne.s32.totalorder %s1084_s1, %s1080_s0 }
  0x29   : > { %p142_p2 = scmp.eq.s32.totalorder %s643_s18, 11  ;;  %p1251_p3 = por %p136_p0, %p135_p12 }
  0x2a   : > { %s1536_s20 = scalar_select %p1245_p13, 1, 0 }
  0x2b   : > { %s1537_s21 = scalar_select %p1251_p3, 1, 0 }
  0x2c   : > { %p646_p4 = scmp.ge.s32.totalorder %s1120_s16, 1  ;;  %p1256_p5 = por %p142_p2, %p141_p1 }
  0x2d   : > { %1538 = sst [smem:[#allocation22_spill]] %s1537_s21  ;;  %p149_p6 = scmp.lt.s32.totalorder %s1120_s16, 13 }
  0x2e   : > { %s1539_s22 = scalar_select %p1256_p5, 1, 0 }
  0x2f   : > { %p1261_p7 = pnand %p646_p4, %p149_p6  ;;  %s1124_s24 = smov [#allocation9]  }
  0x30   : > { %1540 = sst [smem:[#allocation23_spill]] %s1539_s22  ;;  %s161_s25 = sshll.u32 %s1124_s24, 4  ;;  %s162_s25 = int_to_ptr.vmem [resolvable:$true] %s161_s25 }
  0x31   : > { %s1541_s23 = scalar_select %p1261_p7, 1, 0 }
  0x32   : > { %p1270_p8 = por %p65_p11, %p64_p9  ;;  %p785_p12 = pneg %p1261_p7 }
  0x33   : > { %p1505_p1 = scmp.lt.s32.totalorder %s1120_s16, 12  ;;  %s1545_s3 = sld [smem:[#allocation27_spill]] }
  0x34   : > { %s1542_s26 = scalar_select %p1270_p8, 1, 0 }
  0x35   : > { %p1278_p0 = pnand %p785_p12, %p1236_p10  ;;  %p1287_p2 = pnand %p1505_p1, %p1270_p8 }
  0x37   : > { %s1544_s28 = scalar_select %p1287_p2, 1, 0 }
  0x38   : > { %p936_p11 = pneg %p1278_p0 }
  0x39   : > { %s934_s6 = scalar_lea.hbm %s1545_s3, 3072 }
  0x3a   : > { %p935_p9 = scmp.ne.s32.totalorder %s1545_s3, %s934_s6  ;;  %p941_p12 = scmp.lt.u32.totalorder %s934_s6, %s1545_s3 }
  0x3c   : > { %p937_p4 = pnand %p936_p11, %p935_p9 }
  0x3e   : > { %p938_p6 = pneg %p937_p4 }
  0x40   : > { %p943_p1 = pnand %p941_p12, %p938_p6 }
  0x42   : > { %946 = shalt.err (!%p943_p1)
}
  0x43   : > { %s947_s24 = scalar_lea.vmem %s162_s25, 3072  ;;  %p955_p13 = scmp.lt.s32.totalorder %s162_s25, %s162_s25 }
  0x44   : > { %p948_p5 = scmp.ne.s32.totalorder %s162_s25, %s947_s24  ;;  %p956_p7 = scmp.lt.s32.totalorder %s947_s24, %s947_s24 }
  0x46   : > { %p950_p3 = pnand %p948_p5, %p936_p11  ;;  %p957_p2 = por %p956_p7, %p955_p13 }
  0x48   : > { %p951_p10 = pneg %p950_p3 }
  0x4a   : > { %p958_p8 = pnand %p957_p2, %p951_p10 }
  0x4c   : > { %961 = shalt.err (!%p958_p8)
}
  0x4d   : > { %s1516_s29 = smov 64   ;;  %s1517_s30 = smov 4  }
  0x4e   : > { %788 = dma.hbm_to_vmem [thread:$0]  (!%p1278_p0), %s1545_s3, 3072, %s162_s25, [#allocation10], %s1516_s29, %s1516_s29, %s1517_s30  }
  0x4f   : > { %s125_s9 = sadd.s32 1, %s1088_s8  ;;  %s39_s17 = sadd.s32 1, %s1112_s14 }
  0x50   : > { %p40_p10 = scmp.ge.s32.totalorder %s39_s17, 2  ;;  %s42_s18 = sadd.s32 1, %s1116_s15 }
  0x51   : > { %p1546_p13 = scmp.ne.s32.totalorder %s1542_s26, 0  ;;  %s644_s22 = sshll.u32 %s1116_s15, 1 }
  0x52   : > { %s1519_s0 = sand.u32 1, %s1100_s11   ;;  %s1580_s18 = smov (!%p40_p10, %s42_s18), %s1116_s15 }
  0x53   : > { %s777_s24 = scalar_select %p1546_p13, [#allocation4], [#allocation12] }
  0x54   : > { %s1582_s17 = smov (%p40_p10, %s39_s17), 0  ;;  %p44_p3 = scmp.ge.s32.totalorder %s1580_s18, 6 }
  0x55   : > { %1547 = sst [smem:[#allocation24_spill]] %s1582_s17  ;;  %s47_s27 = sadd.s32 %s1112_s14, %s644_s22 }
  0x56   : > { %s48_s25 = sld [smem:[#allocation4 + %s47_s27]]  ;;  %s649_s6 = sshll.u32 %s1519_s0, 5 }
  0x57   : > { %s1584_s18 = smov (%p44_p3, %s1580_s18), 0  ;;  %s1586_s27 = smov (!%p1546_p13, %s47_s27), 0 }
  0x58   : > { %1548 = sst [smem:[#allocation25_spill]] %s1584_s18  ;;  %s645_s7 = sshll.u32 %s1584_s18, 1 }
  0x59   : > { %s52_s29 = ssub.s32 %s1116_s15, %s1584_s18  ;;  %s50_s30 = sadd.s32 %s645_s7, %s1582_s17 }
  0x5a   : > { %p123_p5 = scmp.eq.s32.totalorder %s52_s29, 0  ;;  %s51_s3 = sld [smem:[#allocation4 + %s50_s30]] }
  0x5b   : > { %p1550_p7 = scmp.lt.s32.totalorder %s1120_s16, 12  ;;  %s57_s22 = sadd.s32 1, %s1100_s11 }
  0x5c   : > { %s1332_s5 = scalar_select %p123_p5, %s1088_s8, %s125_s9  }
  0x5d   : > { %s1588_s24 = smov (!%p1550_p7, %s777_s24), [#allocation13]  ;;  %p1551_p8 = pmov %p1550_p7 }
  0x5e   : > { %1549 = sst [smem:[#allocation26_spill]] %s1332_s5  ;;  %s182_s14 = scalar_lea.vmem [#allocation6], %s649_s6 }
  0x5f   : > { %s1590_s27 = smov (!%p1551_p8, %s1586_s27), 0  ;;  %s194_s21 = sshll.u32 %s182_s14, 4  ;;  %s1340_s21 = int_to_ptr.vmem [resolvable:$true] %s194_s21 }
  0x60   : > { %s185_s26 = sld [smem:[%s1588_s24 + %s1590_s27]]  ;;  %s53_s0 = ssub.s32 %s48_s25, %s51_s3 }
  0x61   : > { %s54_s4 = sor.u32 %s53_s0, %s52_s29  ;;  %s774_s18 = smul.u32 24, %s1116_s15 }
  0x62   : > { %p55_p0 = scmp.eq.s32.totalorder %s54_s4, 0  ;;  %s1552_s16 = sand.u32 1, %s1100_s11  }
  0x63   : > { %s1352_s3 = scalar_lea.sflag [#allocation7], %s1552_s16  ;;  %p1553_p2 = scmp.ne.s32.totalorder %s1544_s28, 0 }
  0x64   : > { %s1343_s30 = scalar_select %p55_p0, %s1100_s11, %s57_s22  }
  0x65   : > { %p964_p9 = pneg %p1553_p2  ;;  %s967_s5 = scalar_lea.hbm %s1500_s2, 9216 }
  0x66   : > { %s191_s9 = sadd.s32 %s774_s18, %s185_s26 }
  0x67   : > { %s653_s7 = sshll.u32 %s191_s9, 6 }
  0x68   : > { %s1348_s8 = scalar_lea.hbm %s1500_s2, %s653_s7 }
  0x69   : > { %s962_s0 = scalar_lea.hbm %s1348_s8, 512  ;;  %p968_p6 = scmp.lt.u32.totalorder %s1348_s8, %s1500_s2 }
  0x6a   : > { %p963_p1 = scmp.ne.s32.totalorder %s1348_s8, %s962_s0  ;;  %p969_p12 = scmp.lt.u32.totalorder %s967_s5, %s962_s0 }
  0x6b   : > { %p971_p13 = scmp.lt.u32.totalorder %s962_s0, %s1348_s8 }
  0x6c   : > { %p965_p11 = pnand %p964_p9, %p963_p1  ;;  %p970_p10 = por %p969_p12, %p968_p6 }
  0x6e   : > { %p966_p4 = pneg %p965_p11  ;;  %p972_p3 = por %p971_p13, %p970_p10 }
  0x70   : > { %p973_p5 = pnand %p972_p3, %p966_p4 }
  0x72   : > { %976 = shalt.err (!%p973_p5)
}
  0x73   : > { %s977_s16 = scalar_lea.vmem %s1340_s21, 512  ;;  %s1127_s18 = smov [#allocation6]  }
  0x74   : > { %p978_p7 = scmp.ne.s32.totalorder %s1340_s21, %s977_s16  ;;  %s982_s24 = sshll.u32 %s1127_s18, 4  ;;  %s983_s24 = int_to_ptr.vmem [resolvable:$false] %s982_s24 }
  0x75   : > { %s984_s27 = scalar_lea.vmem %s983_s24, 1024  ;;  %p985_p1 = scmp.lt.s32.totalorder %s1340_s21, %s983_s24 }
  0x76   : > { %p980_p8 = pnand %p978_p7, %p964_p9  ;;  %p986_p11 = scmp.lt.s32.totalorder %s984_s27, %s977_s16 }
  0x78   : > { %p981_p0 = pneg %p980_p8  ;;  %p987_p6 = por %p986_p11, %p985_p1 }
  0x7a   : > { %p988_p12 = pnand %p987_p6, %p981_p0 }
  0x7c   : > { %991 = shalt.err (!%p988_p12)
}
  0x7d   : > { %s1128_s25 = smov 192   ;;  %s1554_s6 = smov 4  }
  0x7e   : > { %s1555_s22 = smov 64   ;;  %p1556_p9 = scmp.ne.s32.totalorder %s1541_s23, 0 }
  0x7f   : > { %794 = dma.hbm_to_vmem [thread:$0]  (!%p1553_p2), %s1348_s8, 512, %s1340_s21, %s1352_s3, %s1128_s25, %s1555_s22, %s1554_s6  }
  0x80   : > { %206 = sbr.rel (%p1556_p9) target bundleno = 462 (0x1ce), region = 32  ;;  %s208_s26 = sand.u32 (!%p1556_p9), 1, %s1096_s10  }
  0x81   : > { %s655_s9 = sshll.u32 (!%p1556_p9), %s208_s26, 5  ;;  %s209_s7 = scalar_lea.sflag (!%p1556_p9), [#allocation7], %s208_s26 }
  0x82   : > { %s1385_s0 = scalar_lea.vmem (!%p1556_p9), [#allocation6], %s655_s9  ;;  %p1557_p4 = scmp.ne.s32.totalorder (!%p1556_p9), %s1536_s20, 0 }
  0x87   : > { %1067 = dma.done.wait (%p1557_p4), %s209_s7, 512  }
  0x88   : > { %1069 = vsyncadd (%p1557_p4), %s209_s7, 4294966784  ;;  %p1558_p10 = scmp.ne.s32.totalorder %s1535_s19, 0 }
  0x8a   : > { %1071 = dma.done.wait (%p1558_p10), [#allocation10], 3072  }
  0x8b   : > { %1073 = vsyncadd (%p1558_p10), [#allocation10], 4294964224  ;;  %s236_s8 = sand.u32 1, %s1084_s1   ;;  %p658_p2 = scmp.ne.s32.totalorder %s1104_s12, 0 }
  0x8c   : > { %s657_s21 = sshll.u32 %s236_s8, 5  ;;  %v1129_v0 = vmov (!%p658_p2), 0.0  }
  0x8d   : > { %s1398_s23 = scalar_lea.vmem [#allocation11], %s657_s21  ;;  %248 = sbr.rel (%p658_p2) target bundleno = 148 (0x94), region = 44  ;;  %249 = vst [vmem:[#allocation2] sm:$0xff] (!%p658_p2), %v1129_v0  ;;  %250 = vst [vmem:[#allocation2 + $0x8] sm:$0xff] (!%p658_p2), %v1129_v0 }
  0x8e   : > { %251 = vst [vmem:[#allocation2 + $0x10] sm:$0xff] (!%p658_p2), %v1129_v0  ;;  %252 = vst [vmem:[#allocation2 + $0x18] sm:$0xff] (!%p658_p2), %v1129_v0 }
  0x8f   : > { %253 = vst [vmem:[#allocation2 + $0x20] sm:$0xff] (!%p658_p2), %v1129_v0  ;;  %254 = vst [vmem:[#allocation2 + $0x28] sm:$0xff] (!%p658_p2), %v1129_v0 }
  0x90   : > { %255 = vst [vmem:[#allocation2 + $0x30] sm:$0xff] (!%p658_p2), %v1129_v0  ;;  %256 = vst [vmem:[#allocation2 + $0x38] sm:$0xff] (!%p658_p2), %v1129_v0 }
  0x94 PF: > { %s257_s19 = sld [smem:[#allocation5 + %s1108_s13]] }
  0x9a   : > { %p659_p13 = scmp.ge.s32.totalorder %s1104_s12, %s257_s19 }
  0x9b   : > { %s660_s20 = sshll.u32 (!%p659_p13), %s1108_s13, 1  ;;  %v908_v1 = vld [vmem:[%s1385_s0] sm:$0xff] (!%p659_p13)   ;;  %v909_v2 = vld [vmem:[%s1385_s0 + $0x10] sm:$0xff] (!%p659_p13)   ;;  %v910_v11 = vld [vmem:[%s1385_s0 + $0x8] sm:$0xff] (!%p659_p13)  }
  0x9c   : > { %261 = sbr.rel (%p659_p13) target bundleno = 418 (0x1a2), region = 48  ;;  %s263_s28 = sadd.s32 (!%p659_p13), %s1104_s12, %s660_s20  ;;  %750 = vmatprep.mubr.bf16.mxu0 (!%p659_p13), %v908_v1  ;;  %754 = vmatprep.mubr.bf16.mxu1 (!%p659_p13), %v909_v2  ;;  %v911_v12 = vld [vmem:[%s1385_s0 + $0x18] sm:$0xff] (!%p659_p13)   ;;  %v268_v13 = vld [vmem:[#allocation2 + $0x10] sm:$0xff] (!%p659_p13)  ;;  %v266_v15 = vld [vmem:[#allocation2] sm:$0xff] (!%p659_p13) }
  0x9d   : > { %s264_s3 = sld [smem:[#allocation4 + %s263_s28]] (!%p659_p13)  ;;  %v272_v14 = vld [vmem:[#allocation2 + $0x30] sm:$0xff] (!%p659_p13)  ;;  %v270_v16 = vld [vmem:[#allocation2 + $0x20] sm:$0xff] (!%p659_p13)  ;;  %v269_v19 = vld [vmem:[#allocation2 + $0x18] sm:$0xff] (!%p659_p13) }
  0x9e   : > { %v273_v20 = vld [vmem:[#allocation2 + $0x38] sm:$0xff] (!%p659_p13)  ;;  %v267_v25 = vld [vmem:[#allocation2 + $0x8] sm:$0xff] (!%p659_p13) }
  0x9f   : > { %v271_v26 = vld [vmem:[#allocation2 + $0x28] sm:$0xff] (!%p659_p13) }
  0xa3   : > { %s661_s4 = sshll.u32 %s264_s3, 7 }
  0xa4   : > { %s282_s14 = sshra.s32 %s661_s4, 3 }
  0xa5   : > { %s662_s5 = sshll.u32 %s282_s14, 2 }
  0xa6   : > { %s1407_s29 = scalar_lea.vmem [#allocation9], %s662_s5 }
  0xa7   : > { %v900_v3 = vld [vmem:[%s1407_s29] sm:$0xff]   ;;  %v901_v4 = vld [vmem:[%s1407_s29 + $0x8] sm:$0xff]   ;;  %v902_v5 = vld [vmem:[%s1407_s29 + $0x10] sm:$0xff]  }
  0xa8   : > { %734 = vmatprep.subr.bf16.mxu0 %v900_v3  ;;  %758 = vmatprep.subr.bf16.mxu1 %v900_v3  ;;  %v903_v6 = vld [vmem:[%s1407_s29 + $0x18] sm:$0xff]   ;;  %v904_v7 = vld [vmem:[%s1407_s29 + $0x20] sm:$0xff]   ;;  %v905_v8 = vld [vmem:[%s1407_s29 + $0x28] sm:$0xff]  }
  0xa9   : > { %735 = vmatpush3.bf16.msra.mxu0 %v900_v3  ;;  %766 = vmatpush3.bf16.msra.mxu1 %v900_v3  ;;  %v906_v9 = vld [vmem:[%s1407_s29 + $0x30] sm:$0xff]   ;;  %v907_v10 = vld [vmem:[%s1407_s29 + $0x38] sm:$0xff]  }
  0xaa   : > { %736 = vmatprep.subr.bf16.mxu0 %v901_v4  ;;  %759 = vmatprep.subr.bf16.mxu1 %v901_v4 }
  0xad   : > { %737 = vmatpush3.bf16.msra.mxu0 %v901_v4  ;;  %767 = vmatpush3.bf16.msra.mxu1 %v901_v4 }
  0xae   : > { %738 = vmatprep.subr.bf16.mxu0 %v902_v5  ;;  %760 = vmatprep.subr.bf16.mxu1 %v902_v5 }
  0xb1   : > { %739 = vmatpush3.bf16.msra.mxu0 %v902_v5  ;;  %768 = vmatpush3.bf16.msra.mxu1 %v902_v5 }
  0xb2   : > { %740 = vmatprep.subr.bf16.mxu0 %v903_v6  ;;  %761 = vmatprep.subr.bf16.mxu1 %v903_v6 }
  0xb5   : > { %741 = vmatpush3.bf16.msra.mxu0 %v903_v6  ;;  %769 = vmatpush3.bf16.msra.mxu1 %v903_v6 }
  0xb6   : > { %742 = vmatprep.subr.bf16.mxu0 %v904_v7  ;;  %762 = vmatprep.subr.bf16.mxu1 %v904_v7 }
  0xb9   : > { %743 = vmatpush3.bf16.msra.mxu0 %v904_v7  ;;  %770 = vmatpush3.bf16.msra.mxu1 %v904_v7 }
  0xba   : > { %744 = vmatprep.subr.bf16.mxu0 %v905_v8  ;;  %763 = vmatprep.subr.bf16.mxu1 %v905_v8 }
  0xbd   : > { %745 = vmatpush3.bf16.msra.mxu0 %v905_v8  ;;  %771 = vmatpush3.bf16.msra.mxu1 %v905_v8 }
  0xbe   : > { %746 = vmatprep.subr.bf16.mxu0 %v906_v9  ;;  %764 = vmatprep.subr.bf16.mxu1 %v906_v9 }
  0xc1   : > { %747 = vmatpush3.bf16.msra.mxu0 %v906_v9  ;;  %772 = vmatpush3.bf16.msra.mxu1 %v906_v9 }
  0xc2   : > { %748 = vmatprep.subr.bf16.mxu0 %v907_v10  ;;  %765 = vmatprep.subr.bf16.mxu1 %v907_v10 }
  0xc5   : > { %749 = vmatpush3.bf16.msra.mxu0 %v907_v10  ;;  %773 = vmatpush3.bf16.msra.mxu1 %v907_v10 }
  0xc8   : > { %751 = vmatmul.mubr.bf16.vlgmr.msra.gmra.mrb[0].mxu0 %v910_v11  ;;  %755 = vmatmul.mubr.bf16.vlgmr.msra.gmra.mrb[0].mxu1 %v911_v12 }
 0x19b   : > { %v752_v17 = vpop.f32.mrb[0].mxu0  ;;  %v756_v18 = vpop.f32.mrb[0].mxu1 }
 0x19c   : > { %v441_v21 = vadd.f32 %v752_v17, %v268_v13  ;;  %v445_v22 = vadd.f32 %v756_v18, %v272_v14  ;;  %v408_v23 = vpop.f32.mrb[1].mxu0  ;;  %v424_v24 = vpop.f32.mrb[1].mxu1 }
 0x19d   : > { %v439_v27 = vadd.f32 %v408_v23, %v266_v15  ;;  %v443_v28 = vadd.f32 %v424_v24, %v270_v16  ;;  %v753_v29 = vpop.f32.mrb[2].mxu0  ;;  %v757_v30 = vpop.f32.mrb[2].mxu1 }
 0x19e   : > { %449 = vst [vmem:[#allocation2 + $0x10] sm:$0xff] %v441_v21  ;;  %453 = vst [vmem:[#allocation2 + $0x30] sm:$0xff] %v445_v22  ;;  %v442_v31 = vadd.f32 %v753_v29, %v269_v19  ;;  %v446_v32 = vadd.f32 %v757_v30, %v273_v20  ;;  %v411_v33 = vpop.f32.mrb[3].mxu0  ;;  %v427_v34 = vpop.f32.mrb[3].mxu1 }
 0x19f   : > { %447 = vst [vmem:[#allocation2] sm:$0xff] %v439_v27  ;;  %451 = vst [vmem:[#allocation2 + $0x20] sm:$0xff] %v443_v28  ;;  %v440_v35 = vadd.f32 %v411_v33, %v267_v25  ;;  %v444_v36 = vadd.f32 %v427_v34, %v271_v26 }
 0x1a0   : > { %450 = vst [vmem:[#allocation2 + $0x18] sm:$0xff] %v442_v31  ;;  %454 = vst [vmem:[#allocation2 + $0x38] sm:$0xff] %v446_v32 }
 0x1a1   : > { %448 = vst [vmem:[#allocation2 + $0x8] sm:$0xff] %v440_v35  ;;  %452 = vst [vmem:[#allocation2 + $0x28] sm:$0xff] %v444_v36 }
 0x1a2 PF: > { %p675_p3 = scmp.ne.s32.totalorder %s1104_s12, 1 }
 0x1a3   : > { %s1559_s18 = sld [smem:[#allocation28_spill]] (!%p675_p3) }
 0x1a4   : > { %458 = sbr.rel (%p675_p3) target bundleno = 434 (0x1b2), region = 52 }
 0x1a5   : > { %v461_v42 = vld [vmem:[#allocation2 + $0x10] sm:$0xff] (!%p675_p3) }
 0x1a6   : > { %v459_v37 = vld [vmem:[#allocation2] sm:$0xff] (!%p675_p3)  ;;  %v465_v49 = vld [vmem:[#allocation2 + $0x30] sm:$0xff] (!%p675_p3) }
 0x1a7   : > { %v462_v43 = vld [vmem:[#allocation2 + $0x18] sm:$0xff] (!%p675_p3)  ;;  %v463_v44 = vld [vmem:[#allocation2 + $0x20] sm:$0xff] (!%p675_p3) }
 0x1a8   : > { %v460_v38 = vld [vmem:[#allocation2 + $0x8] sm:$0xff] (!%p675_p3)  ;;  %v466_v50 = vld [vmem:[#allocation2 + $0x38] sm:$0xff] (!%p675_p3) }
 0x1a9   : > { %v676_v39 = vld [vmem:[%s1559_s18] ss:$0 sm:$0xff] (!%p675_p3)  ;;  %v464_v47 = vld [vmem:[#allocation2 + $0x28] sm:$0xff] (!%p675_p3) }
 0x1aa   : > { %v474_v40 = vadd.f32 (!%p675_p3), %v676_v39, %v459_v37  ;;  %v475_v41 = vadd.f32 (!%p675_p3), %v676_v39, %v460_v38  ;;  %v476_v45 = vadd.f32 (!%p675_p3), %v676_v39, %v461_v42  ;;  %v477_v46 = vadd.f32 (!%p675_p3), %v676_v39, %v462_v43 }
 0x1ab   : > { %v478_v48 = vadd.f32 %v676_v39, %v463_v44  ;;  %v479_v53 = vadd.f32 %v676_v39, %v464_v47  ;;  %v480_v54 = vadd.f32 %v676_v39, %v465_v49  ;;  %v481_v58 = vadd.f32 %v676_v39, %v466_v50 }
 0x1ac   : > { %v482_v51 = vmax.f32 %v474_v40, 0.0  ;;  %v483_v52 = vmax.f32 %v475_v41, 0.0  ;;  %v484_v55 = vmax.f32 %v476_v45, 0.0  ;;  %v485_v56 = vmax.f32 %v477_v46, 0.0 }
 0x1ad   : > { %v486_v57 = vmax.f32 %v478_v48, 0.0  ;;  %v487_v60 = vmax.f32 %v479_v53, 0.0  ;;  %v488_v61 = vmax.f32 %v480_v54, 0.0  ;;  %v489_v63 = vmax.f32 %v481_v58, 0.0 }
 0x1ae   : > { %v702_v59 = vpack.c.bf16 %v483_v52, %v482_v51  ;;  %v707_v62 = vpack.c.bf16 %v485_v56, %v484_v55 }
 0x1af   : > { %v712_v0 = vpack.c.bf16 %v487_v60, %v486_v57  ;;  %v717_v1 = vpack.c.bf16 %v489_v63, %v488_v61 }
 0x1b0   : > { %703 = vst [vmem:[%s1398_s23] sm:$0xff] %v702_v59   ;;  %719 = vst [vmem:[%s1398_s23 + $0x8] sm:$0xff] %v707_v62  }
 0x1b1   : > { %720 = vst [vmem:[%s1398_s23 + $0x10] sm:$0xff] %v712_v0   ;;  %721 = vst [vmem:[%s1398_s23 + $0x18] sm:$0xff] %v717_v1  }
 0x1b2 PF: > { %s1560_s12 = sld [smem:[#allocation22_spill]]  ;;  %s698_s24 = sshll.u32 %s1108_s13, 9 }
 0x1b3   : > { %s1561_s6 = sld [smem:[#allocation29_spill]]  ;;  %s544_s26 = sshll.u32 %s1398_s23, 4  ;;  %s1434_s26 = int_to_ptr.vmem [resolvable:$true] %s544_s26 }
 0x1b4   : > { %s1438_s9 = scalar_lea.sflag [#allocation8], %s236_s8  ;;  %s992_s7 = scalar_lea.vmem %s1434_s26, 512 }
 0x1b5   : > { %p993_p5 = scmp.ne.s32.totalorder %s1434_s26, %s992_s7  ;;  %s1130_s13 = smov [#allocation11]  }
 0x1b6   : > { %s996_s0 = sshll.u32 %s1130_s13, 4  ;;  %s997_s0 = int_to_ptr.vmem [resolvable:$false] %s996_s0 }
 0x1b7   : > { %s998_s21 = scalar_lea.vmem %s997_s0, 1024  ;;  %p999_p1 = scmp.lt.s32.totalorder %s1434_s26, %s997_s0 }
 0x1b8   : > { %p1562_p7 = scmp.ne.s32.totalorder %s1560_s12, 0  ;;  %p1000_p11 = scmp.lt.s32.totalorder %s998_s21, %s992_s7 }
 0x1b9   : > { %s1431_s22 = scalar_lea.hbm %s1561_s6, %s698_s24 }
 0x1ba   : > { %p994_p8 = pnand %p993_p5, %p1562_p7  ;;  %p1001_p6 = por %p1000_p11, %p999_p1 }
 0x1bc   : > { %p995_p0 = pneg %p994_p8 }
 0x1be   : > { %p1002_p12 = pnand %p1001_p6, %p995_p0 }
 0x1c0   : > { %1005 = shalt.err (!%p1002_p12)
}
 0x1c1   : > { %s1006_s8 = scalar_lea.hbm %s1431_s22, 512  ;;  %s1010_s20 = scalar_lea.hbm %s1561_s6, 3072 }
 0x1c2   : > { %p1007_p9 = scmp.ne.s32.totalorder %s1431_s22, %s1006_s8  ;;  %p1011_p2 = scmp.lt.u32.totalorder %s1431_s22, %s1561_s6 }
 0x1c3   : > { %p1012_p13 = scmp.lt.u32.totalorder %s1010_s20, %s1006_s8  ;;  %p1014_p5 = scmp.lt.u32.totalorder %s1006_s8, %s1431_s22 }
 0x1c4   : > { %p1008_p4 = pnand %p1007_p9, %p1562_p7 }
 0x1c5   : > { %p1013_p3 = por %p1012_p13, %p1011_p2 }
 0x1c6   : > { %p1009_p10 = pneg %p1008_p4 }
 0x1c7   : > { %p1015_p8 = por %p1014_p5, %p1013_p3 }
 0x1c9   : > { %p1016_p0 = pnand %p1015_p8, %p1009_p10 }
 0x1cb   : > { %1019 = shalt.err (!%p1016_p0)
}
 0x1cc   : > { %s1131_s4 = smov 64   ;;  %s1132_s14 = smov 4  }
 0x1cd   : > { %783 = dma.vmem_to_hbm [thread:$0]  (%p1562_p7), %s1434_s26, 512, %s1431_s22, %s1438_s9, %s1131_s4, %s1131_s4, %s1132_s14  }
 0x1ce PF: > { %s1563_s5 = sld [smem:[#allocation21_spill]]  ;;  %s1564_s29 = sld [smem:[#allocation18_spill]] }
 0x1cf   : > { %s1565_s17 = sld [smem:[#allocation23_spill]] }
 0x1d4   : > { %p802_p1 = scmp.ge.s32.totalorder %s1563_s5, 2  ;;  %s559_s16 = sand.u32 1, %s1564_s29  }
 0x1d5   : > { %p1566_p11 = scmp.ne.s32.totalorder %s1565_s17, 0  ;;  %s560_s18 = scalar_lea.sflag [#allocation8], %s559_s16 }
 0x1d7   : > { %p796_p6 = pnand %p802_p1, %p1566_p11 }
 0x1d9   : > { %1075 = dma.done.wait (!%p796_p6), %s560_s18, 512  }
 0x1da   : > { %1077 = vsyncadd (!%p796_p6), %s560_s18, 4294966784  ;;  %s30_s16 = sadd.s32 1, %s1563_s5   ;;  %s1567_s24 = sld [smem:[#allocation19_spill]] }
 0x1db   : > { %p27_p12 = scmp.ge.s32.totalorder %s30_s16, 14   ;;  %s1568_s8 = sld [smem:[#allocation26_spill]] }
 0x1dc   : > { %s1569_s12 = sld [smem:[#allocation20_spill]]  ;;  %s1570_s14 = sld [smem:[#allocation24_spill]] }
 0x1dd   : > { %s1571_s27 = sld [smem:[#allocation25_spill]]  ;;  %s1572_s0 = smov %s1084_s1 }
 0x1de   : > { %s1574_s9 = smov %s1096_s10  ;;  %s1575_s10 = smov %s1100_s11 }
 0x1df   : > { %s1576_s11 = smov %s1343_s30  ;;  %s1577_s13 = smov %s1116_s15 }
 0x1e0   : > { %s1573_s1 = smov %s1567_s24  ;;  %29 = sbr.rel (!%p27_p12) target bundleno = 33 (0x21), region = 94 }
 0x1e3   : > { %s1578_s15 = smov %s1571_s27 }
 0x1e7   :  { %565 = vsyncpa [#allocation7], 1 }
 0x1e8   :  { %567 = vsyncpa [#allocation7 + $0x1], 1 }
 0x1e9   :  { %568 = vsyncpa [#allocation10], 1 }
 0x1ea   :  { %569 = vsyncpa [#allocation8], 1 }
 0x1eb   :  { %571 = vsyncpa [#allocation8 + $0x1], 1 }

</bundles_post_ra>
